<compile_context>
chip_gen: v7x
topology: tpu7x:2x2x1
jax: 0.10.0
libtpu: 0.0.40
codegen_flags: <defaults>
</compile_context>

<pallas_src>
import math

import jax
import jax.numpy as jnp
from jax.experimental import pallas as pl
from jax.experimental.pallas import tpu as pltpu

# ---------------------------------------------------------------------------
# Model hyper-parameters (small, consistent with the forward pass semantics)
# ---------------------------------------------------------------------------
BATCH = 2
SEQ = 8
HIDDEN = 32          # true hidden size of the synthetic backbone
FFN = 64             # true FFN size
NUM_LABELS = 2
VOCAB = 100

HP = 128             # hidden padded to one full lane width
FP = 128             # ffn padded to one full lane width
VP = 128             # vocab padded to one full lane width (one-hot gather matmul)
BSP = BATCH * SEQ    # flattened (batch, seq) rows on the sublane axis
LN_EPS = 1e-5

# bf16 weight-slab column layout (every block is 128-lane aligned)
_QKV0, _QKV1 = 0, 3 * HP            # fused Wq|Wk|Wv         (128, 384)
_WO0, _WO1 = _QKV1, _QKV1 + HP      # Wo                     (128, 128)
_W10, _W11 = _WO1, _WO1 + FP        # W1 (hidden -> ffn)     (128, 128)
_W20, _W21 = _W11, _W11 + HP        # W2 (ffn -> hidden)     (128, 128)
_WQA0, _WQA1 = _W21, _W21 + HP      # QA head (cols 0..1)    (128, 128)
_TE0, _TE1 = _WQA1, _WQA1 + HP      # token embedding table  (128, 128)
W_SLAB_COLS = _TE1                  # 1024

# f32 misc-slab row layout
_POS0, _POS1 = 0, BSP               # positional emb, pre-tiled over batch
_B1 = _POS1                         # FFN bias 1
_B2 = _B1 + 1                       # FFN bias 2
_LN1G, _LN1B = _B2 + 1, _B2 + 2
_LN2G, _LN2B = _B2 + 3, _B2 + 4
M_SLAB_ROWS = ((_LN2B + 1 + 7) // 8) * 8   # pad rows to a multiple of 8 (=24)


def encoder_qa_kernel(ids_ref, mask_ref, w_ref, m_ref, out_ref):
    # ---- static, lane/sublane-aligned views of the two packed slabs ----------
    wqkv = w_ref[:, _QKV0:_QKV1]            # (HP, 3*HP) bf16
    wo = w_ref[:, _WO0:_WO1]                # (HP, HP)   bf16
    w1 = w_ref[:, _W10:_W11]                # (HP, FP)   bf16
    w2 = w_ref[:, _W20:_W21]                # (FP, HP)   bf16
    wqa = w_ref[:, _WQA0:_WQA1]             # (HP, HP)   bf16 (cols 0..1 nonzero)
    temb = w_ref[:, _TE0:_TE1]              # (VP, HP)   bf16 token embeddings

    pos = m_ref[_POS0:_POS1, :]             # (BSP, HP) f32, pre-tiled over batch
    b1 = m_ref[_B1:_B1 + 1, :]
    b2 = m_ref[_B2:_B2 + 1, :]
    ln1_g = m_ref[_LN1G:_LN1G + 1, :]
    ln1_b = m_ref[_LN1B:_LN1B + 1, :]
    ln2_g = m_ref[_LN2G:_LN2G + 1, :]
    ln2_b = m_ref[_LN2B:_LN2B + 1, :]

    # ---- fused embedding lookup: one-hot(ids) @ token table (one MXU push) ---
    ids = ids_ref[...]                                           # (BSP, 1) int32
    vocab_iota = jax.lax.broadcasted_iota(jnp.int32, (BSP, VP), 1)
    onehot = jnp.where(vocab_iota == ids, 1.0, 0.0).astype(jnp.bfloat16)
    x = jnp.dot(onehot, temb, preferred_element_type=jnp.float32) + pos  # (BSP,HP)

    # ---- additive attention bias built in-kernel ------------------------------
    # 0 where (same batch AND key token valid), else -1e9.
    mask_row = mask_ref[...]                                     # (1, BSP) int32
    ri = jax.lax.broadcasted_iota(jnp.int32, (BSP, BSP), 0)
    ci = jax.lax.broadcasted_iota(jnp.int32, (BSP, BSP), 1)
    if SEQ & (SEQ - 1) == 0:       # power-of-two seq: batch id is a cheap shift
        sh = int(math.log2(SEQ))
        same_batch = (ri >> sh) == (ci >> sh)
    else:
        same_batch = (ri // SEQ) == (ci // SEQ)
    allowed = same_batch & (mask_row > 0)
    bias = jnp.where(allowed, 0.0, -1e9)                         # (BSP, BSP) f32

    # lane mask for the padded hidden dimension (hoisted; computed once)
    lane_mask = (
        jax.lax.broadcasted_iota(jnp.int32, (1, HP), 1) < HIDDEN
    ).astype(jnp.float32)
    inv_h = 1.0 / HIDDEN

    def layernorm(v, g, b):
        # pad lanes of v are zero by construction; stats use the true H
        mean = jnp.sum(v, axis=-1, keepdims=True) * inv_h
        c = (v - mean) * lane_mask
        var = jnp.sum(c * c, axis=-1, keepdims=True) * inv_h
        return c * jax.lax.rsqrt(var + LN_EPS) * g + b

    # ---- fused QKV projection (1/sqrt(H) pre-folded into Wq) -----------------
    x_bf = x.astype(jnp.bfloat16)
    qkv = jnp.dot(x_bf, wqkv, preferred_element_type=jnp.float32)   # (BSP, 3*HP)
    q = qkv[:, 0:HP]
    k = qkv[:, HP:2 * HP]
    v = qkv[:, 2 * HP:3 * HP]

    # ---- flattened attention over all batch*seq rows --------------------------
    # (bias encodes both the block-diagonal batch structure and key padding)
    scores = jax.lax.dot_general(
        q.astype(jnp.bfloat16), k.astype(jnp.bfloat16),
        dimension_numbers=(((1,), (1,)), ((), ())),
        preferred_element_type=jnp.float32,
    ) + bias
    m = jnp.max(scores, axis=-1, keepdims=True)
    p = jnp.exp(scores - m)
    attn = p * pl.reciprocal(jnp.sum(p, axis=-1, keepdims=True), approx=True)

    ctx = jnp.dot(attn.astype(jnp.bfloat16), v.astype(jnp.bfloat16),
                  preferred_element_type=jnp.float32)            # (BSP, HP)
    attn_out = jnp.dot(ctx.astype(jnp.bfloat16), wo,
                       preferred_element_type=jnp.float32)       # (BSP, HP)

    h1 = layernorm(x + attn_out, ln1_g, ln1_b)

    # ---- feed-forward ----------------------------------------------------------
    f = jnp.dot(h1.astype(jnp.bfloat16), w1,
                preferred_element_type=jnp.float32) + b1
    f = jax.nn.gelu(f, approximate=True)     # tanh GELU -> EUP slot (v5e feedback)
    ffn = jnp.dot(f.astype(jnp.bfloat16), w2,
                  preferred_element_type=jnp.float32) + b2

    h2 = layernorm(h1 + ffn, ln2_g, ln2_b)

    # ---- QA head: one MXU matmul into a lane-dense (BSP, 128) block ----------
    # Only columns 0..NUM_LABELS-1 of wqa are nonzero; sliced in the wrapper.
    out_ref[...] = jnp.dot(h2.astype(jnp.bfloat16), wqa,
                           preferred_element_type=jnp.float32)


def baseline_model_forward(input_ids, attention_mask, params):
    B, S = input_ids.shape
    ids_col = input_ids.reshape(B * S, 1).astype(jnp.int32)      # for one-hot rows
    mask_row = attention_mask.reshape(1, B * S).astype(jnp.int32)  # key validity

    vmem = pl.BlockSpec(memory_space=pltpu.MemorySpace.VMEM)
    out = pl.pallas_call(
        encoder_qa_kernel,
        out_shape=jax.ShapeDtypeStruct((B * S, HP), jnp.float32),
        in_specs=[vmem, vmem, vmem, vmem],
        out_specs=vmem,
    )(ids_col, mask_row, params["w_slab"], params["m_slab"])

    logits = out[:, :NUM_LABELS].reshape(B, S, NUM_LABELS)
    start_logits = logits[..., 0]            # split(1, dim=-1) + 'b s 1 -> b s'
    end_logits = logits[..., 1]
    return start_logits, end_logits


def _pad2(a, shape):
    out = jnp.zeros(shape, a.dtype)
    return out.at[: a.shape[0], : a.shape[1]].set(a)


def make_params(key):
    ks = jax.random.split(key, 10)
    std = 0.02

    tok = jax.random.normal(ks[0], (VOCAB, HIDDEN), jnp.float32) * std
    pos = jax.random.normal(ks[1], (SEQ, HIDDEN), jnp.float32) * std
    wq = jax.random.normal(ks[2], (HIDDEN, HIDDEN), jnp.float32) * std
    wk = jax.random.normal(ks[3], (HIDDEN, HIDDEN), jnp.float32) * std
    wv = jax.random.normal(ks[4], (HIDDEN, HIDDEN), jnp.float32) * std
    wo = jax.random.normal(ks[5], (HIDDEN, HIDDEN), jnp.float32) * std
    w1 = jax.random.normal(ks[6], (HIDDEN, FFN), jnp.float32) * std
    w2 = jax.random.normal(ks[7], (FFN, HIDDEN), jnp.float32) * std
    wqa = jax.random.normal(ks[8], (HIDDEN, NUM_LABELS), jnp.float32) * std

    # fold the 1/sqrt(H) attention scale into Wq at build time
    wq = wq * (1.0 / math.sqrt(HIDDEN))

    # ---- single bf16 weight slab: Wqkv | Wo | W1 | W2 | Wqa | tok_emb --------
    wqkv = jnp.concatenate(
        [_pad2(wq, (HP, HP)), _pad2(wk, (HP, HP)), _pad2(wv, (HP, HP))], axis=1)
    w_slab = jnp.concatenate(
        [wqkv,
         _pad2(wo, (HP, HP)),
         _pad2(w1, (HP, FP)),
         _pad2(w2, (FP, HP)),
         _pad2(wqa, (HP, HP)),          # QA head; only cols 0..NUM_LABELS-1 live
         _pad2(tok, (VP, HP))],         # token embedding table
        axis=1).astype(jnp.bfloat16)
    assert w_slab.shape == (HP, W_SLAB_COLS)

    # ---- single f32 misc slab: tiled pos_emb + FFN biases + LN params --------
    pos_tiled = jnp.tile(_pad2(pos, (SEQ, HP)), (BATCH, 1))      # (BSP, HP)
    m_slab = jnp.zeros((M_SLAB_ROWS, HP), jnp.float32)
    m_slab = m_slab.at[_POS0:_POS1, :].set(pos_tiled)
    # b1/b2 stay zero; layernorm gammas are 1 only on the real hidden lanes
    m_slab = m_slab.at[_LN1G, :HIDDEN].set(1.0)
    m_slab = m_slab.at[_LN2G, :HIDDEN].set(1.0)

    return {"w_slab": w_slab, "m_slab": m_slab}


if __name__ == "__main__":
    key = jax.random.PRNGKey(0)
    k_ids, k_params = jax.random.split(key)

    input_ids = jax.random.randint(k_ids, (BATCH, SEQ), 0, VOCAB, dtype=jnp.int32)
    # attention_mask: first row fully valid, second row last 2 positions padded
    attention_mask = jnp.array(
        [[1] * SEQ, [1] * (SEQ - 2) + [0, 0]], dtype=jnp.int32
    )

    params = make_params(k_params)

    # TODO(synk): pretrained AutoModel / T5-encoder weights cannot be loaded here;
    # a single synthetic encoder layer (deterministic random weights) stands in
    # for the backbone. Dropout is a no-op in eval mode and is omitted.
    start_logits, end_logits = baseline_model_forward(input_ids, attention_mask, params)
    jax.block_until_ready((start_logits, end_logits))

    assert start_logits.shape == (BATCH, SEQ)
    assert end_logits.shape == (BATCH, SEQ)
    assert bool(jnp.all(jnp.isfinite(start_logits)))
    assert bool(jnp.all(jnp.isfinite(end_logits)))
    print("KERNEL_OK")
</pallas_src>

<mosaic_0001>
module attributes {stable_mosaic.version = 11 : i64} {
  func.func @encoder_qa_kernel(%arg0: memref<16x1xi32, #tpu.memory_space<vmem>>, %arg1: memref<1x16xi32, #tpu.memory_space<vmem>>, %arg2: memref<128x1024xbf16, #tpu.memory_space<vmem>>, %arg3: memref<24x128xf32, #tpu.memory_space<vmem>>, %arg4: memref<16x128xf32, #tpu.memory_space<vmem>>) attributes {dimension_semantics = [], scalar_prefetch = 0 : i64, scratch_operands = 0 : i64, tpu.core_type = #tpu.core_type<tc>} {
    %c0 = arith.constant 0 : index
    %c0_0 = arith.constant 0 : index
    %0 = vector.load %arg2[%c0, %c0_0] : memref<128x1024xbf16, #tpu.memory_space<vmem>>, vector<128x384xbf16>
    %c0_1 = arith.constant 0 : index
    %c384 = arith.constant 384 : index
    %1 = vector.load %arg2[%c0_1, %c384] : memref<128x1024xbf16, #tpu.memory_space<vmem>>, vector<128x128xbf16>
    %c0_2 = arith.constant 0 : index
    %c512 = arith.constant 512 : index
    %2 = vector.load %arg2[%c0_2, %c512] : memref<128x1024xbf16, #tpu.memory_space<vmem>>, vector<128x128xbf16>
    %c0_3 = arith.constant 0 : index
    %c640 = arith.constant 640 : index
    %3 = vector.load %arg2[%c0_3, %c640] : memref<128x1024xbf16, #tpu.memory_space<vmem>>, vector<128x128xbf16>
    %c0_4 = arith.constant 0 : index
    %c768 = arith.constant 768 : index
    %4 = vector.load %arg2[%c0_4, %c768] : memref<128x1024xbf16, #tpu.memory_space<vmem>>, vector<128x128xbf16>
    %c0_5 = arith.constant 0 : index
    %c896 = arith.constant 896 : index
    %5 = vector.load %arg2[%c0_5, %c896] : memref<128x1024xbf16, #tpu.memory_space<vmem>>, vector<128x128xbf16>
    %c0_6 = arith.constant 0 : index
    %c0_7 = arith.constant 0 : index
    %6 = vector.load %arg3[%c0_6, %c0_7] : memref<24x128xf32, #tpu.memory_space<vmem>>, vector<16x128xf32>
    %c16 = arith.constant 16 : index
    %c0_8 = arith.constant 0 : index
    %7 = vector.load %arg3[%c16, %c0_8] : memref<24x128xf32, #tpu.memory_space<vmem>>, vector<1x128xf32>
    %c17 = arith.constant 17 : index
    %c0_9 = arith.constant 0 : index
    %8 = vector.load %arg3[%c17, %c0_9] : memref<24x128xf32, #tpu.memory_space<vmem>>, vector<1x128xf32>
    %c18 = arith.constant 18 : index
    %c0_10 = arith.constant 0 : index
    %9 = vector.load %arg3[%c18, %c0_10] : memref<24x128xf32, #tpu.memory_space<vmem>>, vector<1x128xf32>
    %c19 = arith.constant 19 : index
    %c0_11 = arith.constant 0 : index
    %10 = vector.load %arg3[%c19, %c0_11] : memref<24x128xf32, #tpu.memory_space<vmem>>, vector<1x128xf32>
    %c20 = arith.constant 20 : index
    %c0_12 = arith.constant 0 : index
    %11 = vector.load %arg3[%c20, %c0_12] : memref<24x128xf32, #tpu.memory_space<vmem>>, vector<1x128xf32>
    %c21 = arith.constant 21 : index
    %c0_13 = arith.constant 0 : index
    %12 = vector.load %arg3[%c21, %c0_13] : memref<24x128xf32, #tpu.memory_space<vmem>>, vector<1x128xf32>
    %c0_14 = arith.constant 0 : index
    %c0_15 = arith.constant 0 : index
    %13 = vector.load %arg0[%c0_14, %c0_15] : memref<16x1xi32, #tpu.memory_space<vmem>>, vector<16x1xi32>
    %14 = tpu.iota {dimensions = array<i32: 1>} : vector<16x128xi32>
    %15 = vector.broadcast %13 : vector<16x1xi32> to vector<16x128xi32>
    %16 = arith.cmpi eq, %14, %15 : vector<16x128xi32>
    %cst = arith.constant 1.000000e+00 : f32
    %cst_16 = arith.constant 0.000000e+00 : f32
    %17 = vector.broadcast %cst : f32 to vector<16x128xf32>
    %18 = vector.broadcast %cst_16 : f32 to vector<16x128xf32>
    %19 = arith.select %16, %17, %18 : vector<16x128xi1>, vector<16x128xf32>
    %20 = arith.truncf %19 : vector<16x128xf32> to vector<16x128xbf16>
    %cst_17 = arith.constant dense<0.000000e+00> : vector<16x128xf32>
    %21 = tpu.matmul %20, %5, %cst_17 {dimension_numbers = #tpu.dot_dimension_numbers<[1], [0], [0], [1], [0, 0, 1, 1], [], []>} : vector<16x128xbf16>, vector<128x128xbf16>, vector<16x128xf32> -> vector<16x128xf32>
    %22 = arith.addf %21, %6 : vector<16x128xf32>
    %c0_18 = arith.constant 0 : index
    %c0_19 = arith.constant 0 : index
    %23 = vector.load %arg1[%c0_18, %c0_19] : memref<1x16xi32, #tpu.memory_space<vmem>>, vector<1x16xi32>
    %24 = tpu.iota {dimensions = array<i32: 0>} : vector<16x16xi32>
    %25 = tpu.iota {dimensions = array<i32: 1>} : vector<16x16xi32>
    %c3_i32 = arith.constant 3 : i32
    %26 = vector.broadcast %c3_i32 : i32 to vector<16x16xi32>
    %27 = arith.shrsi %24, %26 : vector<16x16xi32>
    %c3_i32_20 = arith.constant 3 : i32
    %28 = vector.broadcast %c3_i32_20 : i32 to vector<16x16xi32>
    %29 = arith.shrsi %25, %28 : vector<16x16xi32>
    %30 = arith.cmpi eq, %27, %29 : vector<16x16xi32>
    %c0_i32 = arith.constant 0 : i32
    %31 = vector.broadcast %c0_i32 : i32 to vector<1x16xi32>
    %32 = arith.cmpi sgt, %23, %31 : vector<1x16xi32>
    %33 = vector.broadcast %32 : vector<1x16xi1> to vector<16x16xi1>
    %34 = arith.andi %30, %33 : vector<16x16xi1>
    %cst_21 = arith.constant 0.000000e+00 : f32
    %cst_22 = arith.constant -1.000000e+09 : f32
    %35 = vector.broadcast %cst_21 : f32 to vector<16x16xf32>
    %36 = vector.broadcast %cst_22 : f32 to vector<16x16xf32>
    %37 = arith.select %34, %35, %36 : vector<16x16xi1>, vector<16x16xf32>
    %38 = tpu.iota {dimensions = array<i32: 1>} : vector<1x128xi32>
    %c32_i32 = arith.constant 32 : i32
    %39 = vector.broadcast %c32_i32 : i32 to vector<1x128xi32>
    %40 = arith.cmpi slt, %38, %39 : vector<1x128xi32>
    %41 = arith.extui %40 : vector<1x128xi1> to vector<1x128xi32>
    %42 = arith.sitofp %41 : vector<1x128xi32> to vector<1x128xf32>
    %43 = arith.truncf %22 : vector<16x128xf32> to vector<16x128xbf16>
    %cst_23 = arith.constant dense<0.000000e+00> : vector<16x384xf32>
    %44 = tpu.matmul %43, %0, %cst_23 {dimension_numbers = #tpu.dot_dimension_numbers<[1], [0], [0], [1], [0, 0, 1, 1], [], []>} : vector<16x128xbf16>, vector<128x384xbf16>, vector<16x384xf32> -> vector<16x384xf32>
    %45 = vector.extract_strided_slice %44 {offsets = [0, 0], sizes = [16, 128], strides = [1, 1]} : vector<16x384xf32> to vector<16x128xf32>
    %46 = vector.extract_strided_slice %44 {offsets = [0, 128], sizes = [16, 128], strides = [1, 1]} : vector<16x384xf32> to vector<16x128xf32>
    %47 = vector.extract_strided_slice %44 {offsets = [0, 256], sizes = [16, 128], strides = [1, 1]} : vector<16x384xf32> to vector<16x128xf32>
    %48 = arith.truncf %45 : vector<16x128xf32> to vector<16x128xbf16>
    %49 = arith.truncf %46 : vector<16x128xf32> to vector<16x128xbf16>
    %cst_24 = arith.constant dense<0.000000e+00> : vector<16x16xf32>
    %50 = tpu.matmul %48, %49, %cst_24 {dimension_numbers = #tpu.dot_dimension_numbers<[1], [1], [0], [0], [0, 0, 1, 0], [], []>} : vector<16x128xbf16>, vector<16x128xbf16>, vector<16x16xf32> -> vector<16x16xf32>
    %51 = arith.addf %50, %37 : vector<16x16xf32>
    %cst_25 = arith.constant dense<0xFF800000> : vector<16xf32>
    %52 = vector.multi_reduction <maximumf>, %51, %cst_25 [1] : vector<16x16xf32> to vector<16xf32>
    %53 = vector.shape_cast %52 : vector<16xf32> to vector<16x1xf32>
    %54 = vector.broadcast %53 : vector<16x1xf32> to vector<16x16xf32>
    %55 = arith.subf %51, %54 : vector<16x16xf32>
    %56 = math.exp %55 : vector<16x16xf32>
    %cst_26 = arith.constant dense<0.000000e+00> : vector<16xf32>
    %57 = vector.multi_reduction <add>, %56, %cst_26 [1] : vector<16x16xf32> to vector<16xf32>
    %58 = vector.shape_cast %57 : vector<16xf32> to vector<16x1xf32>
    %59 = tpu.reciprocal %58 {approx = true} : vector<16x1xf32> -> vector<16x1xf32>
    %60 = vector.broadcast %59 : vector<16x1xf32> to vector<16x16xf32>
    %61 = arith.mulf %56, %60 : vector<16x16xf32>
    %62 = arith.truncf %61 : vector<16x16xf32> to vector<16x16xbf16>
    %63 = arith.truncf %47 : vector<16x128xf32> to vector<16x128xbf16>
    %cst_27 = arith.constant dense<0.000000e+00> : vector<16x128xf32>
    %64 = tpu.matmul %62, %63, %cst_27 {dimension_numbers = #tpu.dot_dimension_numbers<[1], [0], [0], [1], [0, 0, 1, 1], [], []>} : vector<16x16xbf16>, vector<16x128xbf16>, vector<16x128xf32> -> vector<16x128xf32>
    %65 = arith.truncf %64 : vector<16x128xf32> to vector<16x128xbf16>
    %cst_28 = arith.constant dense<0.000000e+00> : vector<16x128xf32>
    %66 = tpu.matmul %65, %1, %cst_28 {dimension_numbers = #tpu.dot_dimension_numbers<[1], [0], [0], [1], [0, 0, 1, 1], [], []>} : vector<16x128xbf16>, vector<128x128xbf16>, vector<16x128xf32> -> vector<16x128xf32>
    %67 = arith.addf %22, %66 : vector<16x128xf32>
    %cst_29 = arith.constant dense<0.000000e+00> : vector<16xf32>
    %68 = vector.multi_reduction <add>, %67, %cst_29 [1] : vector<16x128xf32> to vector<16xf32>
    %69 = vector.shape_cast %68 : vector<16xf32> to vector<16x1xf32>
    %cst_30 = arith.constant 3.125000e-02 : f32
    %70 = vector.broadcast %cst_30 : f32 to vector<16x1xf32>
    %71 = arith.mulf %69, %70 : vector<16x1xf32>
    %72 = vector.broadcast %71 : vector<16x1xf32> to vector<16x128xf32>
    %73 = arith.subf %67, %72 : vector<16x128xf32>
    %74 = vector.broadcast %42 : vector<1x128xf32> to vector<16x128xf32>
    %75 = arith.mulf %73, %74 : vector<16x128xf32>
    %76 = arith.mulf %75, %75 : vector<16x128xf32>
    %cst_31 = arith.constant dense<0.000000e+00> : vector<16xf32>
    %77 = vector.multi_reduction <add>, %76, %cst_31 [1] : vector<16x128xf32> to vector<16xf32>
    %78 = vector.shape_cast %77 : vector<16xf32> to vector<16x1xf32>
    %cst_32 = arith.constant 3.125000e-02 : f32
    %79 = vector.broadcast %cst_32 : f32 to vector<16x1xf32>
    %80 = arith.mulf %78, %79 : vector<16x1xf32>
    %cst_33 = arith.constant 9.99999974E-6 : f32
    %81 = vector.broadcast %cst_33 : f32 to vector<16x1xf32>
    %82 = arith.addf %80, %81 : vector<16x1xf32>
    %83 = math.rsqrt %82 : vector<16x1xf32>
    %84 = vector.broadcast %83 : vector<16x1xf32> to vector<16x128xf32>
    %85 = arith.mulf %75, %84 : vector<16x128xf32>
    %86 = vector.broadcast %9 : vector<1x128xf32> to vector<16x128xf32>
    %87 = arith.mulf %85, %86 : vector<16x128xf32>
    %88 = vector.broadcast %10 : vector<1x128xf32> to vector<16x128xf32>
    %89 = arith.addf %87, %88 : vector<16x128xf32>
    %90 = arith.truncf %89 : vector<16x128xf32> to vector<16x128xbf16>
    %cst_34 = arith.constant dense<0.000000e+00> : vector<16x128xf32>
    %91 = tpu.matmul %90, %2, %cst_34 {dimension_numbers = #tpu.dot_dimension_numbers<[1], [0], [0], [1], [0, 0, 1, 1], [], []>} : vector<16x128xbf16>, vector<128x128xbf16>, vector<16x128xf32> -> vector<16x128xf32>
    %92 = vector.broadcast %7 : vector<1x128xf32> to vector<16x128xf32>
    %93 = arith.addf %91, %92 : vector<16x128xf32>
    %94 = arith.mulf %93, %93 : vector<16x128xf32>
    %95 = arith.mulf %93, %94 : vector<16x128xf32>
    %cst_35 = arith.constant 4.471500e-02 : f32
    %96 = vector.broadcast %cst_35 : f32 to vector<16x128xf32>
    %97 = arith.mulf %96, %95 : vector<16x128xf32>
    %98 = arith.addf %93, %97 : vector<16x128xf32>
    %cst_36 = arith.constant 0.797884583 : f32
    %99 = vector.broadcast %cst_36 : f32 to vector<16x128xf32>
    %100 = arith.mulf %99, %98 : vector<16x128xf32>
    %101 = math.tanh %100 : vector<16x128xf32>
    %cst_37 = arith.constant 1.000000e+00 : f32
    %102 = vector.broadcast %cst_37 : f32 to vector<16x128xf32>
    %103 = arith.addf %102, %101 : vector<16x128xf32>
    %cst_38 = arith.constant 5.000000e-01 : f32
    %104 = vector.broadcast %cst_38 : f32 to vector<16x128xf32>
    %105 = arith.mulf %104, %103 : vector<16x128xf32>
    %106 = arith.mulf %93, %105 : vector<16x128xf32>
    %107 = arith.truncf %106 : vector<16x128xf32> to vector<16x128xbf16>
    %cst_39 = arith.constant dense<0.000000e+00> : vector<16x128xf32>
    %108 = tpu.matmul %107, %3, %cst_39 {dimension_numbers = #tpu.dot_dimension_numbers<[1], [0], [0], [1], [0, 0, 1, 1], [], []>} : vector<16x128xbf16>, vector<128x128xbf16>, vector<16x128xf32> -> vector<16x128xf32>
    %109 = vector.broadcast %8 : vector<1x128xf32> to vector<16x128xf32>
    %110 = arith.addf %108, %109 : vector<16x128xf32>
    %111 = arith.addf %89, %110 : vector<16x128xf32>
    %cst_40 = arith.constant dense<0.000000e+00> : vector<16xf32>
    %112 = vector.multi_reduction <add>, %111, %cst_40 [1] : vector<16x128xf32> to vector<16xf32>
    %113 = vector.shape_cast %112 : vector<16xf32> to vector<16x1xf32>
    %cst_41 = arith.constant 3.125000e-02 : f32
    %114 = vector.broadcast %cst_41 : f32 to vector<16x1xf32>
    %115 = arith.mulf %113, %114 : vector<16x1xf32>
    %116 = vector.broadcast %115 : vector<16x1xf32> to vector<16x128xf32>
    %117 = arith.subf %111, %116 : vector<16x128xf32>
    %118 = vector.broadcast %42 : vector<1x128xf32> to vector<16x128xf32>
    %119 = arith.mulf %117, %118 : vector<16x128xf32>
    %120 = arith.mulf %119, %119 : vector<16x128xf32>
    %cst_42 = arith.constant dense<0.000000e+00> : vector<16xf32>
    %121 = vector.multi_reduction <add>, %120, %cst_42 [1] : vector<16x128xf32> to vector<16xf32>
    %122 = vector.shape_cast %121 : vector<16xf32> to vector<16x1xf32>
    %cst_43 = arith.constant 3.125000e-02 : f32
    %123 = vector.broadcast %cst_43 : f32 to vector<16x1xf32>
    %124 = arith.mulf %122, %123 : vector<16x1xf32>
    %cst_44 = arith.constant 9.99999974E-6 : f32
    %125 = vector.broadcast %cst_44 : f32 to vector<16x1xf32>
    %126 = arith.addf %124, %125 : vector<16x1xf32>
    %127 = math.rsqrt %126 : vector<16x1xf32>
    %128 = vector.broadcast %127 : vector<16x1xf32> to vector<16x128xf32>
    %129 = arith.mulf %119, %128 : vector<16x128xf32>
    %130 = vector.broadcast %11 : vector<1x128xf32> to vector<16x128xf32>
    %131 = arith.mulf %129, %130 : vector<16x128xf32>
    %132 = vector.broadcast %12 : vector<1x128xf32> to vector<16x128xf32>
    %133 = arith.addf %131, %132 : vector<16x128xf32>
    %134 = arith.truncf %133 : vector<16x128xf32> to vector<16x128xbf16>
    %cst_45 = arith.constant dense<0.000000e+00> : vector<16x128xf32>
    %135 = tpu.matmul %134, %4, %cst_45 {dimension_numbers = #tpu.dot_dimension_numbers<[1], [0], [0], [1], [0, 0, 1, 1], [], []>} : vector<16x128xbf16>, vector<128x128xbf16>, vector<16x128xf32> -> vector<16x128xf32>
    %c0_46 = arith.constant 0 : index
    %c0_47 = arith.constant 0 : index
    %136 = vector.load %arg4[%c0_46, %c0_47] : memref<16x128xf32, #tpu.memory_space<vmem>>, vector<16x128xf32>
    tpu.vector_store %arg4[%c0_46, %c0_47], %135 {strides = array<i32>} : memref<16x128xf32, #tpu.memory_space<vmem>>, vector<16x128xf32>,
    return
  }
}

</mosaic_0001>

<bundles_post_ra>
// kernel: tpu_custom_call.1
= control target key start
LH: loop header
LB: loop body
LE: loop exit
PB: predicated region body
PF: predicated region fallthrough
CT: control target
= control target key end

     0   :  { %9 = vsyncpa [#allocation3], 0  ;;  %s1628_s0 = inlined_call_operand.vmem [shape: s32[16,1], index: 0, kind: input, shape index: {}]   ;;  %s1629_s1 = inlined_call_operand.vmem [shape: s32[1,16], index: 1, kind: input, shape index: {}]   ;;  %s1630_s2 = inlined_call_operand.hbm [shape: bf16[128,1024], index: 2, kind: input, shape index: {}]   ;;  %s1631_s3 = inlined_call_operand.vmem [shape: f32[24,128], index: 3, kind: input, shape index: {}]   ;;  %s1632_s4 = inlined_call_operand.hbm [shape: f32[16,128], index: 4, kind: output, shape index: {}]  }
   0x1   :  { %10 = vsyncpa [#allocation4], 0  ;;  %s1430_s15 = smov [#allocation2]   ;;  %s1382_s19 = scalar_lea.hbm %s1630_s2, 8192 }
   0x2   :  { %s20_s16 = sshll.u32 %s1430_s15, 4  ;;  %p1383_p0 = scmp.ne.s32.totalorder %s1630_s2, %s1382_s19  ;;  %s21_s16 = int_to_ptr.vmem [resolvable:$true] %s20_s16 }
   0x3   :  { %p1386_p1 = scmp.lt.u32.totalorder %s1382_s19, %s1630_s2 }
   0x5   :  { %p1388_p2 = pnand %p1386_p1, %p1383_p0 }
   0x7   :  { %1391 = shalt.err (!%p1388_p2)
}
   0x8   :  { %s1392_s24 = scalar_lea.vmem %s21_s16, 8192  ;;  %p1397_p4 = scmp.lt.s32.totalorder %s21_s16, %s21_s16 }
   0x9   :  { %p1393_p3 = scmp.ne.s32.totalorder %s21_s16, %s1392_s24  ;;  %p1398_p5 = scmp.lt.s32.totalorder %s1392_s24, %s1392_s24 }
   0xb   :  { %p1399_p6 = por %p1398_p5, %p1397_p4 }
   0xd   :  { %p1400_p7 = pnand %p1399_p6, %p1393_p3 }
   0xf   :  { %1403 = shalt.err (!%p1400_p7)
}
  0x10   :  { %s1431_s25 = smov 512   ;;  %s1432_s26 = smov 32  }
  0x11   :  { %26 = dma.hbm_to_vmem [thread:$0]  %s1630_s2, 8192, %s21_s16, [#allocation3], %s1431_s25, %s1431_s25, %s1432_s26  }
  0x12   :  { %1426 = dma.done.wait [#allocation3], 8192  }
  0x13   :  { %1427 = vsyncadd [#allocation3], 4294959104  ;;  %v1433_v0 = vmov 0   ;;  %v1434_v1 = vmov 0.0   ;;  %v153_v2 = vld [vmem:[%s1628_s0] sm:$0xff]  ;;  %v154_v5 = vld [vmem:[%s1628_s0 + $0x8] sm:$0xff]  ;;  %v155_v55 = vlaneseq }
  0x14   :  { %1361 = vset.pattern.permute.xlu0 %v1433_v0  ;;  %1218 = vmatprep.subr.bf16.mxu0 %v1434_v1  ;;  %v129_v3 = vld [vmem:[#allocation2 + $0x1c] sm:$0xf]  ;;  %v33_v12 = vld [vmem:[#allocation2] sm:$0xff]  ;;  %vm1435_vm0 = vmmov 0   ;;  %v34_v58 = vld [vmem:[#allocation2 + $0x8] sm:$0xf] }
  0x15   :  { %441 = vmatprep.mubr.bf16.mxu1 %v1433_v0  ;;  %158 = vperm.xlu0 %1361, %v153_v2   ;;  %v130_v4 = vld [vmem:[#allocation2 + $0x3c] sm:$0xf]  ;;  %v35_v13 = vld [vmem:[#allocation2 + $0x20] sm:$0xff]  ;;  %v1498_v57 = vand.u32 127, %v155_v55  ;;  %v36_v59 = vld [vmem:[#allocation2 + $0x28] sm:$0xf] }
  0x16   :  { %v1086_v6 = vcombine.low %v129_v3, %v130_v4  ;;  %v131_v7 = vld [vmem:[#allocation2 + $0x5c] sm:$0xf]  ;;  %1234 = vmatprep.mubr.msk.bf16.mxu0 %vm1435_vm0, %v1434_v1  ;;  %v1098_v15 = vcombine.high %v33_v12, %v35_v13  ;;  %v1097_v16 = vcombine.low %v33_v12, %v35_v13  ;;  %v37_v17 = vld [vmem:[#allocation2 + $0x40] sm:$0xff]  ;;  %v1099_v61 = vcombine.low %v34_v58, %v36_v59  ;;  %v38_v62 = vld [vmem:[#allocation2 + $0x48] sm:$0xf]  ;;  %s1438_s22 = smov [#allocation5]  }
  0x17   :  { %v132_v8 = vld [vmem:[#allocation2 + $0x7c] sm:$0xf]  ;;  %v39_v20 = vld [vmem:[#allocation2 + $0x60] sm:$0xff]  ;;  %v40_v63 = vld [vmem:[#allocation2 + $0x68] sm:$0xf]  ;;  %vm536_vm10 = vcmask 130048  }
  0x18   :  { %1219 = vmatpush3.bf16.msra.mxu0 %v1086_v6  ;;  %v1087_v9 = vcombine.low %v131_v7, %v132_v8  ;;  %v133_v10 = vld [vmem:[#allocation2 + $0x9c] sm:$0xf]  ;;  %409 = vmatprep.subr.bf16.mxu1 %v1098_v15  ;;  %v1101_v21 = vcombine.high %v37_v17, %v39_v20  ;;  %v1100_v22 = vcombine.low %v37_v17, %v39_v20  ;;  %v41_v24 = vld [vmem:[#allocation2 + $0x80] sm:$0xff]  ;;  %v1436_v2 = vmov 1.0|1.0   ;;  %s1074_s23 = sshll.u32 %s1438_s22, 4  ;;  %s1075_s23 = int_to_ptr.vmem [resolvable:$true] %s1074_s23 }
  0x19   :  { %161 = vperm.xlu0 %1361, %v154_v5   ;;  %1220 = vmatprep.subr.bf16.mxu0 %v1434_v1  ;;  %v134_v11 = vld [vmem:[#allocation2 + $0xbc] sm:$0xf]  ;;  %v43_v25 = vld [vmem:[#allocation2 + $0xa0] sm:$0xff]  ;;  %v1102_v3 = vcombine.low %v38_v62, %v40_v63  ;;  %v42_v4 = vld [vmem:[#allocation2 + $0x88] sm:$0xf]  ;;  %vm277_vm11 = vcmp.lt.s32.totalorder %v1498_v57, 32  ;;  %p1409_p9 = scmp.lt.s32.totalorder %s1075_s23, %s1075_s23 }
  0x1a   :  { %v1088_v14 = vcombine.low %v133_v10, %v134_v11  ;;  %v135_v18 = vld [vmem:[#allocation2 + $0xdc] sm:$0xf]  ;;  %410 = vmatpush1.bf16.msra.mxu1 %v1097_v16  ;;  %v1104_v28 = vcombine.high %v41_v24, %v43_v25  ;;  %v1103_v29 = vcombine.low %v41_v24, %v43_v25  ;;  %v45_v31 = vld [vmem:[#allocation2 + $0xc0] sm:$0xff]  ;;  %v44_v5 = vld [vmem:[#allocation2 + $0xa8] sm:$0xf]  ;;  %s1404_s24 = scalar_lea.vmem %s1075_s23, 256 }
  0x1b   :  { %v136_v19 = vld [vmem:[#allocation2 + $0xfc] sm:$0xf]  ;;  %411 = vmatprep.subr.bf16.mxu1 %v1101_v21  ;;  %v47_v32 = vld [vmem:[#allocation2 + $0xe0] sm:$0xff]  ;;  %v1105_v6 = vcombine.low %v42_v4, %v44_v5  ;;  %v46_v7 = vld [vmem:[#allocation2 + $0xc8] sm:$0xf]  ;;  %p1405_p8 = scmp.ne.s32.totalorder %s1075_s23, %s1404_s24  ;;  %p1410_p10 = scmp.lt.s32.totalorder %s1404_s24, %s1404_s24 }
  0x1c   :  { %1221 = vmatpush3.bf16.msra.mxu0 %v1087_v9  ;;  %v1089_v23 = vcombine.low %v135_v18, %v136_v19  ;;  %v137_v26 = vld [vmem:[#allocation2 + $0x11c] sm:$0xf]  ;;  %v1107_v35 = vcombine.high %v45_v31, %v47_v32  ;;  %v1106_v36 = vcombine.low %v45_v31, %v47_v32  ;;  %v49_v38 = vld [vmem:[#allocation2 + $0x100] sm:$0xff]  ;;  %v48_v8 = vld [vmem:[#allocation2 + $0xe8] sm:$0xf] }
  0x1d   :  { %1222 = vmatprep.subr.bf16.mxu0 %v1434_v1  ;;  %v138_v27 = vld [vmem:[#allocation2 + $0x13c] sm:$0xf]  ;;  %v51_v39 = vld [vmem:[#allocation2 + $0x120] sm:$0xff]  ;;  %v1108_v9 = vcombine.low %v46_v7, %v48_v8  ;;  %v50_v10 = vld [vmem:[#allocation2 + $0x108] sm:$0xf]  ;;  %p1411_p11 = por %p1410_p10, %p1409_p9 }
  0x1e   :  { %412 = vmatpush1.bf16.msra.mxu1 %v1100_v22  ;;  %v1090_v30 = vcombine.low %v137_v26, %v138_v27  ;;  %v139_v33 = vld [vmem:[#allocation2 + $0x15c] sm:$0xf]  ;;  %v1110_v42 = vcombine.high %v49_v38, %v51_v39  ;;  %v1109_v43 = vcombine.low %v49_v38, %v51_v39  ;;  %v53_v45 = vld [vmem:[#allocation2 + $0x140] sm:$0xff]  ;;  %v52_v11 = vld [vmem:[#allocation2 + $0x128] sm:$0xf] }
  0x1f   :  { %413 = vmatprep.subr.bf16.mxu1 %v1104_v28  ;;  %v140_v34 = vld [vmem:[#allocation2 + $0x17c] sm:$0xf]  ;;  %v55_v46 = vld [vmem:[#allocation2 + $0x160] sm:$0xff]  ;;  %v1111_v12 = vcombine.low %v50_v10, %v52_v11  ;;  %v54_v13 = vld [vmem:[#allocation2 + $0x148] sm:$0xf]  ;;  %p1412_p12 = pnand %p1411_p11, %p1405_p8 }
  0x20   :  { %1223 = vmatpush3.bf16.msra.mxu0 %v1088_v14  ;;  %v1091_v37 = vcombine.low %v139_v33, %v140_v34  ;;  %v141_v40 = vld [vmem:[#allocation2 + $0x19c] sm:$0xf]  ;;  %v1113_v49 = vcombine.high %v53_v45, %v55_v46  ;;  %v1112_v50 = vcombine.low %v53_v45, %v55_v46  ;;  %v57_v52 = vld [vmem:[#allocation2 + $0x180] sm:$0xff]  ;;  %v56_v14 = vld [vmem:[#allocation2 + $0x168] sm:$0xf] }
  0x21   :  { %1224 = vmatprep.subr.bf16.mxu0 %v1434_v1  ;;  %v142_v41 = vld [vmem:[#allocation2 + $0x1bc] sm:$0xf]  ;;  %v59_v53 = vld [vmem:[#allocation2 + $0x1a0] sm:$0xff]  ;;  %v1114_v15 = vcombine.low %v54_v13, %v56_v14  ;;  %v58_v16 = vld [vmem:[#allocation2 + $0x188] sm:$0xf] }
  0x22   :  { %414 = vmatpush1.bf16.msra.mxu1 %v1103_v29  ;;  %v1092_v44 = vcombine.low %v141_v40, %v142_v41  ;;  %v143_v47 = vld [vmem:[#allocation2 + $0x1dc] sm:$0xf]  ;;  %v1116_v54 = vcombine.high %v57_v52, %v59_v53  ;;  %v60_v17 = vld [vmem:[#allocation2 + $0x1a8] sm:$0xf]  ;;  %v1115_v18 = vcombine.low %v57_v52, %v59_v53  ;;  %v61_v20 = vld [vmem:[#allocation2 + $0x1c0] sm:$0xff]  ;;  %v263_v53 = vshra.s32 %v1498_v57, 3 }
  0x23   :  { %415 = vmatprep.subr.bf16.mxu1 %v1107_v35  ;;  %v144_v48 = vld [vmem:[#allocation2 + $0x1fc] sm:$0xf]  ;;  %v1117_v19 = vcombine.low %v58_v16, %v60_v17  ;;  %v63_v21 = vld [vmem:[#allocation2 + $0x1e0] sm:$0xff]  ;;  %v64_v24 = vld [vmem:[#allocation2 + $0x1e8] sm:$0xf] }
  0x24   :  { %1225 = vmatpush3.bf16.msra.mxu0 %v1089_v23  ;;  %v1093_v51 = vcombine.low %v143_v47, %v144_v48  ;;  %v1119_v22 = vcombine.high %v61_v20, %v63_v21  ;;  %v62_v23 = vld [vmem:[#allocation2 + $0x1c8] sm:$0xf]  ;;  %v1118_v25 = vcombine.low %v61_v20, %v63_v21  ;;  %v145_v27 = vld [vmem:[%s1631_s3] sm:$0xff]  ;;  %v146_v29 = vld [vmem:[%s1631_s3 + $0x8] sm:$0xff]  ;;  %v259_v48 = vshrl.u32 %v155_v55, 7 }
  0x25   :  { %1226 = vmatprep.subr.bf16.mxu0 %v1434_v1  ;;  %v1120_v26 = vcombine.low %v62_v23, %v64_v24  ;;  %v257_v47 = vld [vmem:[%s1629_s1] sm:$0x1]  ;;  %v1437_v58 = vmov -1e+09  }
  0x26   :  { %416 = vmatpush1.bf16.msra.mxu1 %v1106_v36  ;;  %vm266_vm4 = vcmp.gt.s32.totalorder %v257_v47, 0  ;;  %v261_v52 = vshra.s32 %v259_v48, 3 }
  0x27   :  { %417 = vmatprep.subr.bf16.mxu1 %v1110_v42 }
  0x28   :  { %1227 = vmatpush3.bf16.msra.mxu0 %v1090_v30  ;;  %vm264_vm5 = vcmp.eq.s32.totalorder %v261_v52, %v263_v53 }
  0x29   :  { %1228 = vmatprep.subr.bf16.mxu0 %v1434_v1 }
  0x2a   :  { %418 = vmatpush1.bf16.msra.mxu1 %v1109_v43 }
  0x2b   :  { %419 = vmatprep.subr.bf16.mxu1 %v1113_v49  ;;  %v270_v49 = vsub.s32 0, %v259_v48 }
  0x2c   :  { %1229 = vmatpush3.bf16.msra.mxu0 %v1091_v37 }
  0x2d   :  { %1230 = vmatprep.subr.bf16.mxu0 %v1434_v1 }
  0x2e   :  { %420 = vmatpush1.bf16.msra.mxu1 %v1112_v50  ;;  %v267_v50 = vsel %vm266_vm4, 1, %v1433_v0 }
  0x2f   :  { %421 = vmatprep.subr.bf16.mxu1 %v1116_v54  ;;  %v271_v54 = vrot.slane %v267_v50, %v270_v49 }
  0x30   :  { %1231 = vmatpush3.bf16.msra.mxu0 %v1092_v44 }
  0x31   :  { %1232 = vmatprep.subr.bf16.mxu0 %v1434_v1  ;;  %vm272_vm6 = vcmp.eq.s32.totalorder %v271_v54, 1 }
  0x32   :  { %422 = vmatpush1.bf16.msra.mxu1 %v1115_v18  ;;  %vm273_vm8 = vmand %vm264_vm5, %vm272_vm6  ;;  %v65_v18 = vld [vmem:[#allocation2 + $0xc] sm:$0xf] }
  0x33   :  { %423 = vmatprep.subr.bf16.mxu1 %v1119_v22  ;;  %v275_v59 = vsel %vm273_vm8, 0.0, %v1437_v58 }
  0x34   :  { %1233 = vmatpush3.bf16.msra.mxu0 %v1093_v51  ;;  %v260_v51 = vadd.s32 8, %v259_v48 }
  0x35   :  { %1238 = vmatprep.subr.bf16.mxu0 %v1434_v1 }
  0x36   :  { %424 = vmatpush1.bf16.msra.mxu1 %v1118_v25  ;;  %v67_v25 = vld [vmem:[#allocation2 + $0x4c] sm:$0xf] }
  0x37   :  { %1258 = vmatprep.subr.bf16.mxu1 %v1434_v1 }
  0x94   :  { %v159_v56 = vpop.permute.xlu0 %158 }
  0x95   :  { %vm163_vm1 = vcmp.eq.s32.totalorder %v1498_v57, %v159_v56  ;;  %v262_v56 = vshra.s32 %v260_v51, 3 }
  0x97   :  { %vm265_vm7 = vcmp.eq.s32.totalorder %v262_v56, %v263_v53 }
  0x98   :  { %v162_v60 = vpop.permute.xlu0 %161  ;;  %vm274_vm9 = vmand %vm265_vm7, %vm272_vm6 }
  0x99   :  { %vm164_vm2 = vcmp.eq.s32.totalorder %v1498_v57, %v162_v60 }
  0x9a   :  { %vm1094_vm3 = vmpackc.low %vm164_vm2, %vm163_vm1 }
  0x9b   :  { %1235 = vmatmul.mubr.msk.bf16.vlgmr.msra.gmra.mrb[0].mxu0 %vm1094_vm3, %v1436_v2 }
  0x9c   :  { %1239 = vmatpush3.bf16.msra.mxu0 %v1099_v61  ;;  %1254 = vmatprep.mubr.msk.bf16.mxu0 %vm1435_vm0, %v1434_v1  ;;  %v276_v61 = vsel %vm274_vm9, 0.0, %v1437_v58 }
  0x9d   :  { %1240 = vmatprep.subr.bf16.mxu0 %v1434_v1 }
  0xa0   :  { %1241 = vmatpush3.bf16.msra.mxu0 %v1102_v3 }
  0xa1   :  { %1242 = vmatprep.subr.bf16.mxu0 %v1434_v1 }
  0xa4   :  { %1243 = vmatpush3.bf16.msra.mxu0 %v1105_v6 }
  0xa5   :  { %1244 = vmatprep.subr.bf16.mxu0 %v1434_v1 }
  0xa8   :  { %1245 = vmatpush3.bf16.msra.mxu0 %v1108_v9 }
  0xa9   :  { %1246 = vmatprep.subr.bf16.mxu0 %v1434_v1 }
  0xac   :  { %1247 = vmatpush3.bf16.msra.mxu0 %v1111_v12 }
  0xad   :  { %1248 = vmatprep.subr.bf16.mxu0 %v1434_v1 }
  0xb0   :  { %1249 = vmatpush3.bf16.msra.mxu0 %v1114_v15 }
  0xb1   :  { %1250 = vmatprep.subr.bf16.mxu0 %v1434_v1 }
  0xb4   :  { %1251 = vmatpush3.bf16.msra.mxu0 %v1117_v19  ;;  %v66_v19 = vld [vmem:[#allocation2 + $0x2c] sm:$0xf] }
  0xb5   :  { %1252 = vmatprep.subr.bf16.mxu0 %v1434_v1  ;;  %v1122_v23 = vcombine.low %v65_v18, %v66_v19  ;;  %v90_v18 = vld [vmem:[#allocation2 + $0x130] sm:$0xf] }
  0xb8   :  { %1253 = vmatpush3.bf16.msra.mxu0 %v1120_v26  ;;  %v68_v26 = vld [vmem:[#allocation2 + $0x6c] sm:$0xf] }
  0xb9   :  { %1290 = vmatprep.subr.bf16.mxu0 %v1434_v1 }
 0x16e   :  { %v250_v28 = vpop.f32.mrb[0].mxu0 }
 0x16f   :  { %v1236_v30 = vpop.f32.mrb[1].mxu0  ;;  %v1519_v32 = vadd.f32 %v250_v28, %v145_v27  ;;  %v1123_v27 = vcombine.low %v67_v25, %v68_v26  ;;  %v69_v28 = vld [vmem:[#allocation2 + $0x8c] sm:$0xf]  ;;  %v95_v26 = vld [vmem:[#allocation2 + $0x1d0] sm:$0xf] }
 0x170   :  { %v253_v31 = vpop.f32.mrb[2].mxu0 }
 0x171   :  { %v1521_v33 = vadd.f32 %v253_v31, %v146_v29  ;;  %v1237_v34 = vpop.f32.mrb[3].mxu0  ;;  %v70_v29 = vld [vmem:[#allocation2 + $0xac] sm:$0xf] }
 0x172   :  { %v1124_v30 = vcombine.low %v69_v28, %v70_v29  ;;  %v71_v31 = vld [vmem:[#allocation2 + $0xcc] sm:$0xf] }
 0x173   :  { %v280_v35 = vpack.c.bf16 %v1521_v33, %v1519_v32  ;;  %v72_v34 = vld [vmem:[#allocation2 + $0xec] sm:$0xf] }
 0x175   :  { %442 = vmatmul.mubr.bf16.vlgmr.msra.gmra.mrb[0].mxu1 %v280_v35  ;;  %1255 = vmatmul.mubr.bf16.vlgmr.msra.gmra.mrb[4].mxu0 %v280_v35  ;;  %v1125_v35 = vcombine.low %v71_v31, %v72_v34 }
 0x176   :  { %1260 = vmatprep.mubr.msk.bf16.mxu1 %vm1435_vm0, %v1434_v1  ;;  %1306 = vmatprep.mubr.msk.bf16.mxu0 %vm1435_vm0, %v1434_v1 }
 0x248   :  { %v443_v36 = vpop.f32.mrb[0].mxu1  ;;  %v486_v37 = vpop.f32.mrb[4].mxu0 }
 0x249   :  { %v445_v38 = vpop.f32.mrb[1].mxu1  ;;  %v1256_v39 = vpop.f32.mrb[5].mxu0 }
 0x24a   :  { %v447_v40 = vpop.f32.mrb[2].mxu1  ;;  %v489_v41 = vpop.f32.mrb[6].mxu0  ;;  %v75_v39 = vld [vmem:[#allocation2 + $0x14c] sm:$0xf] }
 0x24b   :  { %v493_v42 = vpack.c.bf16 %v447_v40, %v443_v36  ;;  %v560_v43 = vpack.c.bf16 %v489_v41, %v486_v37  ;;  %v449_v44 = vpop.f32.mrb[3].mxu1  ;;  %v1257_v45 = vpop.f32.mrb[7].mxu0  ;;  %v73_v36 = vld [vmem:[#allocation2 + $0x10c] sm:$0xf] }
 0x24c   :  { %v494_v46 = vpack.c.bf16 %v449_v44, %v445_v38  ;;  %v74_v37 = vld [vmem:[#allocation2 + $0x12c] sm:$0xf] }
 0x24d   :  { %v1126_v38 = vcombine.low %v73_v36, %v74_v37  ;;  %v76_v40 = vld [vmem:[#allocation2 + $0x16c] sm:$0xf] }
 0x24e   :  { %1259 = vmatpush3.bf16.xpose.msra.mxu1 %v494_v46  ;;  %v1127_v41 = vcombine.low %v75_v39, %v76_v40  ;;  %v79_v45 = vld [vmem:[#allocation2 + $0x1cc] sm:$0xf]  ;;  %v1130_v39 = vld [vmem:[%s1631_s3 + $0x12] ss:$0 sm:$0xff] }
 0x24f   :  { %1264 = vmatprep.subr.bf16.mxu1 %v1434_v1  ;;  %v80_v46 = vld [vmem:[#allocation2 + $0x1ec] sm:$0xf] }
 0x250   :  { %v1129_v47 = vcombine.low %v79_v45, %v80_v46 }
 0x255   :  { %1261 = vmatmul.mubr.bf16.vlgmr.msra.gmra.mrb[4].mxu1 %v493_v42  ;;  %v77_v42 = vld [vmem:[#allocation2 + $0x18c] sm:$0xf] }
 0x256   :  { %1265 = vmatpush3.bf16.msra.mxu1 %v560_v43  ;;  %1266 = vmatprep.mubr.msk.bf16.mxu1 %vm1435_vm0, %v1434_v1  ;;  %v78_v43 = vld [vmem:[#allocation2 + $0x1ac] sm:$0xf] }
 0x257   :  { %1270 = vmatprep.subr.bf16.mxu1 %v1434_v1  ;;  %v1128_v44 = vcombine.low %v77_v42, %v78_v43  ;;  %v1131_v43 = vld [vmem:[%s1631_s3 + $0x13] ss:$0 sm:$0xff] }
 0x328   :  { %v529_v60 = vpop.f32.mrb[4].mxu1 }
 0x329   :  { %v530_v55 = vadd.f32 %v529_v60, %v275_v59  ;;  %v1262_v62 = vpop.f32.mrb[5].mxu1 }
 0x32a   :  { %v532_v63 = vpop.f32.mrb[6].mxu1 }
 0x32b   :  { %v533_v0 = vadd.f32 %v532_v63, %v276_v61  ;;  %v1263_v2 = vpop.f32.mrb[7].mxu1  ;;  %v537_v3 = vsel %vm536_vm10, %v530_v55, -inf  ;;  %v81_v61 = vld [vmem:[#allocation2 + $0x10] sm:$0xf] }
 0x32c   :  { %538 = vmax.xlane.f32.xlu1 %v537_v3  ;;  %v1561_v2 = vsel %vm277_vm11, 1.0, %v1434_v1 }
 0x32d   :  { %v540_v4 = vsel %vm536_vm10, %v533_v0, -inf }
 0x330   :  { %541 = vmax.xlane.f32.xlu1 %v540_v4 }
 0x3b9   :  { %v539_v5 = vpop.xlane.xlu1 %538 }
 0x3ba   :  { %v543_v6 = vsub.f32 %v530_v55, %v539_v5  ;;  %v82_v55 = vld [vmem:[#allocation2 + $0x30] sm:$0xf] }
 0x3bb   :  { %v1133_v62 = vcombine.low %v81_v61, %v82_v55  ;;  %v105_v55 = vld [vmem:[#allocation2 + $0x114] sm:$0xf] }
 0x3bc   :  { %v545_v7 = vmul.f32 1.442695, %v543_v6 }
 0x3bd   :  { %v542_v8 = vpop.xlane.xlu1 %541  ;;  %1291 = vmatpush3.bf16.msra.mxu0 %v1133_v62  ;;  %v106_v62 = vld [vmem:[#allocation2 + $0x134] sm:$0xf] }
 0x3be   :  { %1362 = vpow2.f32 %v545_v7  ;;  %v544_v9 = vsub.f32 %v533_v0, %v542_v8  ;;  %1292 = vmatprep.subr.bf16.mxu0 %v1434_v1 }
 0x3c0   :  { %v547_v10 = vmul.f32 1.442695, %v544_v9  ;;  %v83_v9 = vld [vmem:[#allocation2 + $0x50] sm:$0xf] }
 0x3c2   :  { %1364 = vpow2.f32 %v547_v10  ;;  %v84_v10 = vld [vmem:[#allocation2 + $0x70] sm:$0xf] }
 0x3c3   :  { %v1134_v57 = vcombine.low %v83_v9, %v84_v10  ;;  %v1132_v9 = vld [vmem:[%s1631_s3 + $0x10] ss:$0 sm:$0xff] }
 0x3c5   :  { %1293 = vmatpush3.bf16.msra.mxu0 %v1134_v57 }
 0x3c6   :  { %1294 = vmatprep.subr.bf16.mxu0 %v1434_v1 }
 0x3c8   :  { %v1363_v11 = vpop.eup %1362 }
 0x3c9   :  { %v549_v12 = vsel %vm536_vm10, %v1363_v11, 0.0 }
 0x3ca   :  { %550 = vadd.xlane.f32.xlu0 %v549_v12  ;;  %v86_v12 = vld [vmem:[#allocation2 + $0xb0] sm:$0xf] }
 0x3cc   :  { %v1365_v13 = vpop.eup %1364 }
 0x3cd   :  { %v552_v14 = vsel %vm536_vm10, %v1365_v13, 0.0 }
 0x3ce   :  { %553 = vadd.xlane.f32.xlu1 %v552_v14  ;;  %v87_v14 = vld [vmem:[#allocation2 + $0xd0] sm:$0xf] }
 0x457   :  { %v551_v15 = vpop.xlane.xlu0 %550 }
 0x458   :  { %1366 = vrcp.f32 %v551_v15  ;;  %v88_v15 = vld [vmem:[#allocation2 + $0xf0] sm:$0xf] }
 0x45b   :  { %v554_v16 = vpop.xlane.xlu1 %553 }
 0x45c   :  { %1368 = vrcp.f32 %v554_v16  ;;  %v1136_v16 = vcombine.low %v87_v14, %v88_v15 }
 0x462   :  { %v1367_v17 = vpop.eup %1366 }
 0x463   :  { %v557_v21 = vmul.f32 %v1367_v17, %v1363_v11  ;;  %v85_v11 = vld [vmem:[#allocation2 + $0x90] sm:$0xf] }
 0x464   :  { %v89_v17 = vld [vmem:[#allocation2 + $0x110] sm:$0xf] }
 0x465   :  { %v1137_v19 = vcombine.low %v89_v17, %v90_v18 }
 0x466   :  { %v1369_v20 = vpop.eup %1368 }
 0x467   :  { %v558_v22 = vmul.f32 %v1369_v20, %v1365_v13  ;;  %v1135_v13 = vcombine.low %v85_v11, %v86_v12  ;;  %v91_v20 = vld [vmem:[#allocation2 + $0x150] sm:$0xf] }
 0x469   :  { %v559_v24 = vpack.c.bf16 %v558_v22, %v557_v21  ;;  %1295 = vmatpush3.bf16.msra.mxu0 %v1135_v13  ;;  %v92_v21 = vld [vmem:[#allocation2 + $0x170] sm:$0xf] }
 0x46a   :  { %1296 = vmatprep.subr.bf16.mxu0 %v1434_v1  ;;  %v1138_v22 = vcombine.low %v91_v20, %v92_v21 }
 0x46b   :  { %1267 = vmatmul.mubr.msk.bf16.vlgmr.msra.gmra.mrb[8].mxu1 %vm536_vm10, %v559_v24  ;;  %v94_v24 = vld [vmem:[#allocation2 + $0x1b0] sm:$0xf] }
 0x46c   :  { %1271 = vmatpush3.bf16.msra.mxu1 %v1122_v23  ;;  %1286 = vmatprep.mubr.msk.bf16.mxu1 %vm1435_vm0, %v1434_v1  ;;  %v93_v23 = vld [vmem:[#allocation2 + $0x190] sm:$0xf] }
 0x46d   :  { %1272 = vmatprep.subr.bf16.mxu1 %v1434_v1  ;;  %1297 = vmatpush3.bf16.msra.mxu0 %v1136_v16  ;;  %v1139_v25 = vcombine.low %v93_v23, %v94_v24 }
 0x46e   :  { %1298 = vmatprep.subr.bf16.mxu0 %v1434_v1 }
 0x470   :  { %1273 = vmatpush3.bf16.msra.mxu1 %v1123_v27  ;;  %v96_v27 = vld [vmem:[#allocation2 + $0x1f0] sm:$0xf] }
 0x471   :  { %1274 = vmatprep.subr.bf16.mxu1 %v1434_v1  ;;  %1299 = vmatpush3.bf16.msra.mxu0 %v1137_v19  ;;  %v1140_v28 = vcombine.low %v95_v26, %v96_v27 }
 0x472   :  { %1300 = vmatprep.subr.bf16.mxu0 %v1434_v1 }
 0x474   :  { %1275 = vmatpush3.bf16.msra.mxu1 %v1124_v30 }
 0x475   :  { %1276 = vmatprep.subr.bf16.mxu1 %v1434_v1  ;;  %1301 = vmatpush3.bf16.msra.mxu0 %v1138_v22 }
 0x476   :  { %1302 = vmatprep.subr.bf16.mxu0 %v1434_v1 }
 0x478   :  { %1277 = vmatpush3.bf16.msra.mxu1 %v1125_v35 }
 0x479   :  { %1278 = vmatprep.subr.bf16.mxu1 %v1434_v1  ;;  %1303 = vmatpush3.bf16.msra.mxu0 %v1139_v25 }
 0x47a   :  { %1304 = vmatprep.subr.bf16.mxu0 %v1434_v1 }
 0x47c   :  { %1279 = vmatpush3.bf16.msra.mxu1 %v1126_v38 }
 0x47d   :  { %1280 = vmatprep.subr.bf16.mxu1 %v1434_v1  ;;  %1305 = vmatpush3.bf16.msra.mxu0 %v1140_v28 }
 0x47e   :  { %1330 = vmatprep.subr.bf16.mxu0 %v1434_v1 }
 0x480   :  { %1281 = vmatpush3.bf16.msra.mxu1 %v1127_v41 }
 0x481   :  { %1282 = vmatprep.subr.bf16.mxu1 %v1434_v1 }
 0x484   :  { %1283 = vmatpush3.bf16.msra.mxu1 %v1128_v44 }
 0x485   :  { %1284 = vmatprep.subr.bf16.mxu1 %v1434_v1 }
 0x488   :  { %1285 = vmatpush3.bf16.msra.mxu1 %v1129_v47 }
 0x489   :  { %1310 = vmatprep.subr.bf16.mxu1 %v1434_v1 }
 0x53e   :  { %v598_v48 = vpop.f32.mrb[8].mxu1 }
 0x53f   :  { %v1268_v49 = vpop.f32.mrb[9].mxu1 }
 0x540   :  { %v601_v50 = vpop.f32.mrb[10].mxu1  ;;  %v98_v49 = vld [vmem:[#allocation2 + $0x34] sm:$0xf] }
 0x541   :  { %v605_v51 = vpack.c.bf16 %v601_v50, %v598_v48  ;;  %v1269_v52 = vpop.f32.mrb[11].mxu1  ;;  %v97_v48 = vld [vmem:[#allocation2 + $0x14] sm:$0xf] }
 0x542   :  { %v1142_v50 = vcombine.low %v97_v48, %v98_v49  ;;  %v100_v52 = vld [vmem:[#allocation2 + $0x74] sm:$0xf]  ;;  %v114_v48 = vld [vmem:[#allocation2 + $0x38] sm:$0xf] }
 0x543   :  { %1287 = vmatmul.mubr.bf16.vlgmr.msra.gmra.mrb[12].mxu1 %v605_v51  ;;  %v99_v51 = vld [vmem:[#allocation2 + $0x54] sm:$0xf] }
 0x544   :  { %1326 = vmatprep.mubr.msk.bf16.mxu1 %vm1435_vm0, %v1434_v1  ;;  %1311 = vmatpush3.bf16.msra.mxu1 %v1142_v50 }
 0x545   :  { %1312 = vmatprep.subr.bf16.mxu1 %v1434_v1 }
 0x616   :  { %v688_v53 = vpop.f32.mrb[12].mxu1 }
 0x617   :  { %v695_v54 = vadd.f32 %v688_v53, %v1519_v32  ;;  %v1288_v56 = vpop.f32.mrb[13].mxu1  ;;  %v1143_v53 = vcombine.low %v99_v51, %v100_v52 }
 0x618   :  { %v691_v58 = vpop.f32.mrb[14].mxu1  ;;  %v102_v56 = vld [vmem:[#allocation2 + $0xb4] sm:$0xf] }
 0x619   :  { %697 = vadd.xlane.f32.xlu1 %v695_v54  ;;  %v1289_v59 = vpop.f32.mrb[15].mxu1  ;;  %v696_v60 = vadd.f32 %v691_v58, %v1521_v33  ;;  %1313 = vmatpush3.bf16.msra.mxu1 %v1143_v53 }
 0x61a   :  { %1314 = vmatprep.subr.bf16.mxu1 %v1434_v1  ;;  %v103_v59 = vld [vmem:[#allocation2 + $0xd4] sm:$0xf] }
 0x61d   :  { %699 = vadd.xlane.f32.xlu1 %v696_v60 }
 0x6a6   :  { %v698_v63 = vpop.xlane.xlu1 %697 }
 0x6a7   :  { %v701_v0 = vmul.f32 0.03125, %v698_v63  ;;  %v1146_v63 = vcombine.low %v105_v55, %v106_v62  ;;  %v117_v62 = vld [vmem:[#allocation2 + $0x98] sm:$0xf] }
 0x6a9   :  { %v703_v32 = vsub.f32 %v695_v54, %v701_v0  ;;  %v101_v54 = vld [vmem:[#allocation2 + $0x94] sm:$0xf] }
 0x6aa   :  { %v700_v3 = vpop.xlane.xlu1 %699  ;;  %v1144_v58 = vcombine.low %v101_v54, %v102_v56  ;;  %v107_v0 = vld [vmem:[#allocation2 + $0x154] sm:$0xf] }
 0x6ab   :  { %v702_v4 = vmul.f32 0.03125, %v700_v3  ;;  %v705_v5 = vmul.f32 %v1561_v2, %v703_v32  ;;  %v108_v32 = vld [vmem:[#allocation2 + $0x174] sm:$0xf] }
 0x6ac   :  { %1315 = vmatpush3.bf16.msra.mxu1 %v1144_v58  ;;  %v1147_v3 = vcombine.low %v107_v0, %v108_v32  ;;  %v119_v32 = vld [vmem:[#allocation2 + $0xd8] sm:$0xf] }
 0x6ad   :  { %v704_v33 = vsub.f32 %v696_v60, %v702_v4  ;;  %v707_v6 = vmul.f32 %v705_v5, %v705_v5  ;;  %1316 = vmatprep.subr.bf16.mxu1 %v1434_v1  ;;  %v104_v60 = vld [vmem:[#allocation2 + $0xf4] sm:$0xf] }
 0x6ae   :  { %v1145_v61 = vcombine.low %v103_v59, %v104_v60  ;;  %v109_v4 = vld [vmem:[#allocation2 + $0x194] sm:$0xf]  ;;  %v115_v60 = vld [vmem:[#allocation2 + $0x58] sm:$0xf] }
 0x6af   :  { %709 = vadd.xlane.f32.xlu1 %v707_v6  ;;  %v706_v7 = vmul.f32 %v1561_v2, %v704_v33  ;;  %v111_v6 = vld [vmem:[#allocation2 + $0x1d4] sm:$0xf] }
 0x6b0   :  { %1317 = vmatpush3.bf16.msra.mxu1 %v1145_v61  ;;  %v116_v61 = vld [vmem:[#allocation2 + $0x78] sm:$0xf] }
 0x6b1   :  { %v708_v8 = vmul.f32 %v706_v7, %v706_v7  ;;  %1318 = vmatprep.subr.bf16.mxu1 %v1434_v1  ;;  %v1153_v55 = vcombine.low %v115_v60, %v116_v61 }
 0x6b3   :  { %711 = vadd.xlane.f32.xlu1 %v708_v8 }
 0x6b4   :  { %1319 = vmatpush3.bf16.msra.mxu1 %v1146_v63  ;;  %v118_v63 = vld [vmem:[#allocation2 + $0xb8] sm:$0xf] }
 0x6b5   :  { %1320 = vmatprep.subr.bf16.mxu1 %v1434_v1  ;;  %v1154_v0 = vcombine.low %v117_v62, %v118_v63 }
 0x6b8   :  { %1321 = vmatpush3.bf16.msra.mxu1 %v1147_v3  ;;  %v120_v3 = vld [vmem:[#allocation2 + $0xf8] sm:$0xf] }
 0x6b9   :  { %1322 = vmatprep.subr.bf16.mxu1 %v1434_v1 }
 0x73c   :  { %v710_v29 = vpop.xlane.xlu1 %709 }
 0x73d   :  { %v713_v30 = vmul.f32 0.03125, %v710_v29 }
 0x73f   :  { %v715_v31 = vadd.f32 1e-05, %v713_v30 }
 0x740   :  { %v712_v34 = vpop.xlane.xlu1 %711 }
 0x741   :  { %1370 = vrsqrt.f32 %v715_v31  ;;  %v714_v35 = vmul.f32 0.03125, %v712_v34 }
 0x743   :  { %v716_v36 = vadd.f32 1e-05, %v714_v35 }
 0x745   :  { %1372 = vrsqrt.f32 %v716_v36  ;;  %v1141_v36 = vld [vmem:[%s1631_s3 + $0x11] ss:$0 sm:$0xff] }
 0x74b   :  { %v1371_v37 = vpop.eup %1370 }
 0x74c   :  { %v719_v38 = vmul.f32 %v1371_v37, %v705_v5  ;;  %v110_v5 = vld [vmem:[#allocation2 + $0x1b4] sm:$0xf] }
 0x74d   :  { %v1148_v33 = vcombine.low %v109_v4, %v110_v5  ;;  %v1155_v4 = vcombine.low %v119_v32, %v120_v3  ;;  %v122_v5 = vld [vmem:[#allocation2 + $0x138] sm:$0xf] }
 0x74e   :  { %v725_v42 = vmul.f32 %v1130_v39, %v719_v38 }
 0x74f   :  { %v1373_v40 = vpop.eup %1372  ;;  %1323 = vmatpush3.bf16.msra.mxu1 %v1148_v33 }
 0x750   :  { %v720_v41 = vmul.f32 %v1373_v40, %v706_v7  ;;  %v1578_v45 = vadd.f32 %v1131_v43, %v725_v42  ;;  %1324 = vmatprep.subr.bf16.mxu1 %v1434_v1  ;;  %v112_v7 = vld [vmem:[#allocation2 + $0x1f4] sm:$0xf] }
 0x751   :  { %v1149_v8 = vcombine.low %v111_v6, %v112_v7  ;;  %v123_v6 = vld [vmem:[#allocation2 + $0x158] sm:$0xf] }
 0x752   :  { %v726_v44 = vmul.f32 %v1130_v39, %v720_v41  ;;  %v124_v7 = vld [vmem:[#allocation2 + $0x178] sm:$0xf] }
 0x753   :  { %1325 = vmatpush3.bf16.msra.mxu1 %v1149_v8  ;;  %v1157_v8 = vcombine.low %v123_v6, %v124_v7 }
 0x754   :  { %v1580_v46 = vadd.f32 %v1131_v43, %v726_v44 }
 0x756   :  { %v733_v47 = vpack.c.bf16 %v1580_v46, %v1578_v45 }
 0x758   :  { %1307 = vmatmul.mubr.bf16.vlgmr.msra.gmra.mrb[8].mxu0 %v733_v47  ;;  %v113_v47 = vld [vmem:[#allocation2 + $0x18] sm:$0xf] }
 0x759   :  { %1346 = vmatprep.mubr.msk.bf16.mxu0 %vm1435_vm0, %v1434_v1  ;;  %v1152_v49 = vcombine.low %v113_v47, %v114_v48 }
 0x75b   :  { %1331 = vmatpush3.bf16.msra.mxu0 %v1152_v49 }
 0x75c   :  { %1332 = vmatprep.subr.bf16.mxu0 %v1434_v1 }
 0x75f   :  { %1333 = vmatpush3.bf16.msra.mxu0 %v1153_v55 }
 0x760   :  { %1334 = vmatprep.subr.bf16.mxu0 %v1434_v1 }
 0x763   :  { %1335 = vmatpush3.bf16.msra.mxu0 %v1154_v0 }
 0x764   :  { %1336 = vmatprep.subr.bf16.mxu0 %v1434_v1 }
 0x767   :  { %1337 = vmatpush3.bf16.msra.mxu0 %v1155_v4 }
 0x768   :  { %1338 = vmatprep.subr.bf16.mxu0 %v1434_v1 }
 0x82b   :  { %v820_v10 = vpop.f32.mrb[8].mxu0 }
 0x82c   :  { %v821_v57 = vadd.f32 %v1132_v9, %v820_v10  ;;  %v1308_v11 = vpop.f32.mrb[9].mxu0  ;;  %v126_v10 = vld [vmem:[#allocation2 + $0x1b8] sm:$0xf] }
 0x82d   :  { %v823_v12 = vpop.f32.mrb[10].mxu0  ;;  %v127_v11 = vld [vmem:[#allocation2 + $0x1d8] sm:$0xf] }
 0x82e   :  { %v827_v13 = vmul.f32 %v821_v57, %v821_v57  ;;  %v824_v14 = vadd.f32 %v1132_v9, %v823_v12  ;;  %v1309_v15 = vpop.f32.mrb[11].mxu0  ;;  %v125_v9 = vld [vmem:[#allocation2 + $0x198] sm:$0xf] }
 0x82f   :  { %v128_v12 = vld [vmem:[#allocation2 + $0x1f8] sm:$0xf] }
 0x830   :  { %v829_v16 = vmul.f32 %v827_v13, %v821_v57  ;;  %v828_v17 = vmul.f32 %v824_v14, %v824_v14  ;;  %v1159_v13 = vcombine.low %v127_v11, %v128_v12 }
 0x832   :  { %v831_v18 = vmul.f32 0.044715, %v829_v16  ;;  %v830_v19 = vmul.f32 %v828_v17, %v824_v14 }
 0x834   :  { %v833_v20 = vadd.f32 %v831_v18, %v821_v57  ;;  %v832_v21 = vmul.f32 0.044715, %v830_v19 }
 0x836   :  { %v835_v22 = vmul.f32 0.7978846, %v833_v20  ;;  %v834_v23 = vadd.f32 %v832_v21, %v824_v14 }
 0x838   :  { %1374 = vtanh.f32 %v835_v22  ;;  %v836_v24 = vmul.f32 0.7978846, %v834_v23  ;;  %v1150_v22 = vld [vmem:[%s1631_s3 + $0x14] ss:$0 sm:$0xff] }
 0x83a   :  { %1376 = vtanh.f32 %v836_v24 }
 0x842   :  { %v1375_v25 = vpop.eup %1374 }
 0x843   :  { %v839_v26 = vadd.f32 1.0, %v1375_v25 }
 0x844   :  { %v1377_v27 = vpop.eup %1376 }
 0x845   :  { %v841_v28 = vmul.f32 0.5, %v839_v26  ;;  %v840_v29 = vadd.f32 1.0, %v1377_v27 }
 0x847   :  { %v842_v30 = vmul.f32 0.5, %v840_v29  ;;  %v843_v31 = vmul.f32 %v841_v28, %v821_v57  ;;  %v1158_v57 = vcombine.low %v125_v9, %v126_v10 }
 0x849   :  { %v844_v34 = vmul.f32 %v842_v30, %v824_v14 }
 0x84b   :  { %v845_v35 = vpack.c.bf16 %v844_v34, %v843_v31 }
 0x84d   :  { %1327 = vmatmul.mubr.bf16.vlgmr.msra.gmra.mrb[16].mxu1 %v845_v35 }
 0x920   :  { %v932_v37 = vpop.f32.mrb[16].mxu1 }
 0x921   :  { %v933_v38 = vadd.f32 %v1141_v36, %v932_v37  ;;  %v1328_v39 = vpop.f32.mrb[17].mxu1 }
 0x922   :  { %v935_v40 = vpop.f32.mrb[18].mxu1 }
 0x923   :  { %v936_v41 = vadd.f32 %v1141_v36, %v935_v40  ;;  %v1329_v42 = vpop.f32.mrb[19].mxu1  ;;  %v939_v43 = vadd.f32 %v933_v38, %v1578_v45 }
 0x925   :  { %941 = vadd.xlane.f32.xlu1 %v939_v43  ;;  %v940_v44 = vadd.f32 %v936_v41, %v1580_v46 }
 0x929   :  { %943 = vadd.xlane.f32.xlu1 %v940_v44 }
 0x9b2   :  { %v942_v50 = vpop.xlane.xlu1 %941 }
 0x9b3   :  { %v945_v51 = vmul.f32 0.03125, %v942_v50 }
 0x9b5   :  { %v947_v52 = vsub.f32 %v939_v43, %v945_v51 }
 0x9b6   :  { %v944_v53 = vpop.xlane.xlu1 %943 }
 0x9b7   :  { %v946_v54 = vmul.f32 0.03125, %v944_v53  ;;  %v949_v56 = vmul.f32 %v1561_v2, %v947_v52 }
 0x9b9   :  { %v948_v58 = vsub.f32 %v940_v44, %v946_v54  ;;  %v951_v59 = vmul.f32 %v949_v56, %v949_v56 }
 0x9bb   :  { %953 = vadd.xlane.f32.xlu1 %v951_v59  ;;  %v950_v45 = vmul.f32 %v1561_v2, %v948_v58  ;;  %v121_v2 = vld [vmem:[#allocation2 + $0x118] sm:$0xf] }
 0x9bc   :  { %v1156_v33 = vcombine.low %v121_v2, %v122_v5 }
 0x9bd   :  { %v952_v46 = vmul.f32 %v950_v45, %v950_v45 }
 0x9be   :  { %1339 = vmatpush3.bf16.msra.mxu0 %v1156_v33 }
 0x9bf   :  { %955 = vadd.xlane.f32.xlu0 %v952_v46  ;;  %1340 = vmatprep.subr.bf16.mxu0 %v1434_v1 }
 0x9c2   :  { %1341 = vmatpush3.bf16.msra.mxu0 %v1157_v8 }
 0x9c3   :  { %1342 = vmatprep.subr.bf16.mxu0 %v1434_v1 }
 0x9c6   :  { %1343 = vmatpush3.bf16.msra.mxu0 %v1158_v57 }
 0x9c7   :  { %1344 = vmatprep.subr.bf16.mxu0 %v1434_v1  ;;  %v1151_v1 = vld [vmem:[%s1631_s3 + $0x15] ss:$0 sm:$0xff] }
 0x9ca   :  { %1345 = vmatpush3.bf16.msra.mxu0 %v1159_v13 }
 0xa48   :  { %v954_v14 = vpop.xlane.xlu1 %953 }
 0xa49   :  { %v957_v15 = vmul.f32 0.03125, %v954_v14 }
 0xa4b   :  { %v959_v16 = vadd.f32 1e-05, %v957_v15 }
 0xa4c   :  { %v956_v17 = vpop.xlane.xlu0 %955 }
 0xa4d   :  { %1378 = vrsqrt.f32 %v959_v16  ;;  %v958_v18 = vmul.f32 0.03125, %v956_v17 }
 0xa4f   :  { %v960_v19 = vadd.f32 1e-05, %v958_v18 }
 0xa51   :  { %1380 = vrsqrt.f32 %v960_v19 }
 0xa57   :  { %v1379_v20 = vpop.eup %1378 }
 0xa58   :  { %v963_v21 = vmul.f32 %v1379_v20, %v949_v56 }
 0xa5a   :  { %v969_v25 = vmul.f32 %v1150_v22, %v963_v21 }
 0xa5b   :  { %v1381_v23 = vpop.eup %1380 }
 0xa5c   :  { %v964_v24 = vmul.f32 %v1381_v23, %v950_v45  ;;  %v975_v27 = vadd.f32 %v1151_v1, %v969_v25 }
 0xa5e   :  { %v970_v26 = vmul.f32 %v1150_v22, %v964_v24 }
 0xa60   :  { %v976_v28 = vadd.f32 %v1151_v1, %v970_v26 }
 0xa62   :  { %v977_v29 = vpack.c.bf16 %v976_v28, %v975_v27 }
 0xa64   :  { %1347 = vmatmul.mubr.bf16.vlgmr.msra.gmra.mrb[12].mxu0 %v977_v29 }
 0xb37   :  { %v1060_v30 = vpop.f32.mrb[12].mxu0 }
 0xb38   :  { %1067 = vst [vmem:[#allocation5] sm:$0xff] %v1060_v30  ;;  %v1348_v31 = vpop.f32.mrb[13].mxu0 }
 0xb39   :  { %v1063_v34 = vpop.f32.mrb[14].mxu0 }
 0xb3a   :  { %1068 = vst [vmem:[#allocation5 + $0x8] sm:$0xff] %v1063_v34  ;;  %v1349_v35 = vpop.f32.mrb[15].mxu0 }
 0xb3b   :  { %1415 = shalt.err (!%p1412_p12)
}
 0xb3c   :  { %s1416_s26 = scalar_lea.hbm %s1632_s4, 256 }
 0xb3d   :  { %p1417_p13 = scmp.ne.s32.totalorder %s1632_s4, %s1416_s26  ;;  %p1420_p0 = scmp.lt.u32.totalorder %s1416_s26, %s1632_s4 }
 0xb3f   :  { %p1422_p1 = pnand %p1420_p0, %p1417_p13 }
 0xb41   :  { %1425 = shalt.err (!%p1422_p1)
}
 0xb42   :  { %s1439_s5 = smov 128   ;;  %s1440_s6 = smov 8  }
 0xb43   :  { %1080 = dma.vmem_to_hbm [thread:$0]  %s1075_s23, 256, %s1632_s4, [#allocation4], %s1439_s5, %s1439_s5, %s1440_s6  }
 0xb44   :  { %1428 = dma.done.wait [#allocation4], 256  }
 0xb45   :  { %1429 = vsyncadd [#allocation4], 4294967040 }
 0xb46   :  { %1084 = vsyncpa [#allocation3], 1 }
 0xb47   :  { %1085 = vsyncpa [#allocation4], 1 }

</bundles_post_ra>
